<compile_context>
chip_gen: v7x
topology: tpu7x:2x2x1
jax: 0.10.0
libtpu: 0.0.40
codegen_flags: <defaults>
</compile_context>

<pallas_src>
import math

import jax
import jax.numpy as jnp
from jax.experimental import pallas as pl
from jax.experimental.pallas import tpu as pltpu


def _round_up(a, b):
    return (a + b - 1) // b * b


def _vmem_budget_bytes():
    """Generation-aware VMEM budget: ~3/4 of physical capacity."""
    try:
        cap = int(pltpu.get_tpu_info().vmem_capacity_bytes)
    except Exception:
        cap = 64 * 1024 * 1024  # conservative (v7x-sized) fallback
    return (cap * 3) // 4, cap


def prepare_ffn_params(w1, b1, w2, b2, *, weight_dtype=jnp.bfloat16):
    """One-time parameter prep (hoisted out of the per-step hot path).

    nn.Linear stores weights as (out_features, in_features); transpose once to
    (in, out) and cast to the MXU-native dtype. Biases stay f32 — they are
    added to the f32 accumulator.
    """
    w1t = jnp.asarray(w1).T.astype(weight_dtype)               # (d_model, d_ff)
    w2t = jnp.asarray(w2).T.astype(weight_dtype)               # (d_ff, d_model)
    b1r = jnp.asarray(b1).reshape(1, -1).astype(jnp.float32)   # (1, d_ff)
    b2r = jnp.asarray(b2).reshape(1, -1).astype(jnp.float32)   # (1, d_model)
    return w1t, b1r, w2t, b2r


# --------------------------------------------------------------------------
# Kernels
# --------------------------------------------------------------------------
def _ffn_resident_kernel(x_ref, w1_ref, b1_ref, w2_ref, b2_ref, o_ref):
    # x_ref : (tm, d_model) row tile; weights fully VMEM-resident.
    x = x_ref[...].astype(w1_ref.dtype)
    h = jnp.dot(x, w1_ref[...], preferred_element_type=jnp.float32)
    h = jnp.maximum(h + b1_ref[...], 0.0)                      # ReLU (f32)
    # dropout == identity (eval-mode forward)
    y = jnp.dot(h.astype(w2_ref.dtype), w2_ref[...],
                preferred_element_type=jnp.float32)
    o_ref[...] = (y + b2_ref[...]).astype(o_ref.dtype)


def _ffn_dff_tiled_kernel(x_ref, w1_ref, b1_ref, w2_ref, b2_ref, o_ref, acc_ref):
    # Streaming d_ff tiles: grid axis 1 (k) is the reduction over d_ff chunks.
    k = pl.program_id(1)

    @pl.when(k == 0)
    def _():
        acc_ref[...] = jnp.zeros_like(acc_ref)

    x = x_ref[...].astype(w1_ref.dtype)
    h = jnp.dot(x, w1_ref[...], preferred_element_type=jnp.float32)
    h = jnp.maximum(h + b1_ref[...], 0.0)                      # exact per-tile ReLU
    acc_ref[...] += jnp.dot(h.astype(w2_ref.dtype), w2_ref[...],
                            preferred_element_type=jnp.float32)

    @pl.when(k == pl.num_programs(1) - 1)
    def _():
        o_ref[...] = (acc_ref[...] + b2_ref[...]).astype(o_ref.dtype)


# --------------------------------------------------------------------------
# Launchers
# --------------------------------------------------------------------------
def _run_resident(x2, w1t, b1r, w2t, b2r, *, tm, grid_rows, vmem_limit):
    n, d_model = x2.shape
    d_ff = w1t.shape[1]

    def build(single_buffer_weights):
        kw = {"pipeline_mode": pl.Buffered(1)} if single_buffer_weights else {}
        grid_spec = pltpu.PrefetchScalarGridSpec(
            num_scalar_prefetch=0,
            grid=(grid_rows,),
            in_specs=[
                pl.BlockSpec((tm, d_model), lambda i: (i, 0)),
                # Constant index_map -> loaded once, VMEM-resident for all steps.
                pl.BlockSpec((d_model, d_ff), lambda i: (0, 0), **kw),
                pl.BlockSpec((1, d_ff), lambda i: (0, 0), **kw),
                pl.BlockSpec((d_ff, d_model), lambda i: (0, 0), **kw),
                pl.BlockSpec((1, d_model), lambda i: (0, 0), **kw),
            ],
            out_specs=pl.BlockSpec((tm, d_model), lambda i: (i, 0)),
        )
        return pl.pallas_call(
            _ffn_resident_kernel,
            out_shape=jax.ShapeDtypeStruct((n, d_model), x2.dtype),
            grid_spec=grid_spec,
            compiler_params=pltpu.CompilerParams(
                dimension_semantics=("parallel",),
                vmem_limit_bytes=vmem_limit,
            ),
        )

    try:
        return build(True)(x2, w1t, b1r, w2t, b2r)
    except Exception:
        # Fallback if this JAX build rejects pipeline_mode/Buffered(1).
        return build(False)(x2, w1t, b1r, w2t, b2r)


def _run_dff_tiled(x2, w1t, b1r, w2t, b2r, *, tm, tf, grid_rows, vmem_limit):
    n, d_model = x2.shape
    d_ff = w1t.shape[1]
    assert d_ff % tf == 0, "d_ff tile must evenly divide d_ff"
    grid = (grid_rows, d_ff // tf)

    grid_spec = pltpu.PrefetchScalarGridSpec(
        num_scalar_prefetch=0,
        grid=grid,
        in_specs=[
            pl.BlockSpec((tm, d_model), lambda i, k: (i, 0)),
            pl.BlockSpec((d_model, tf), lambda i, k: (0, k)),
            pl.BlockSpec((1, tf), lambda i, k: (0, k)),
            pl.BlockSpec((tf, d_model), lambda i, k: (k, 0)),
            pl.BlockSpec((1, d_model), lambda i, k: (0, 0)),
        ],
        out_specs=pl.BlockSpec((tm, d_model), lambda i, k: (i, 0)),
        scratch_shapes=[pltpu.VMEM((tm, d_model), jnp.float32)],
    )
    return pl.pallas_call(
        _ffn_dff_tiled_kernel,
        out_shape=jax.ShapeDtypeStruct((n, d_model), x2.dtype),
        grid_spec=grid_spec,
        compiler_params=pltpu.CompilerParams(
            dimension_semantics=("parallel", "arbitrary"),
            vmem_limit_bytes=vmem_limit,
        ),
    )(x2, w1t, b1r, w2t, b2r)


def positionwise_feed_forward(x, params, *, block_rows=None, d_ff_tile=None):
    """x: (..., d_model); params from prepare_ffn_params()."""
    w1t, b1r, w2t, b2r = params
    d_model, d_ff = w1t.shape
    assert x.shape[-1] == d_model

    orig_shape = x.shape
    n = math.prod(orig_shape[:-1])
    x2 = x.reshape(n, d_model)

    vmem_budget, vmem_cap = _vmem_budget_bytes()

    # Row tile: bigger on 128-MiB parts (v5e/v6e), smaller on v7x (64 MiB).
    if block_rows is None:
        block_rows = 512 if vmem_cap >= 96 * 1024 * 1024 else 256
    if n <= block_rows:
        # Keep >= 2 row steps when n is small so both v7x TensorCores get work.
        tm = max(8, _round_up(pl.cdiv(n, 2), 8))
    else:
        tm = block_rows
    tm = min(tm, _round_up(n, 8))
    grid_rows = pl.cdiv(n, tm)

    wbytes = jnp.dtype(w1t.dtype).itemsize
    xbytes = jnp.dtype(x2.dtype).itemsize

    def _resident_footprint(rows):
        weights = 2 * d_model * d_ff * wbytes          # single-buffered W1 + W2
        biases = (d_ff + d_model) * 4
        io = 2 * rows * d_model * 2 * xbytes           # double-buffered x / out tiles
        inter = rows * d_ff * (4 + wbytes)             # f32 h + low-precision copy
        return weights + biases + io + inter + (2 << 20)

    use_tiled, tf = False, None
    if d_ff_tile is not None:
        use_tiled, tf = True, int(d_ff_tile)
    elif _resident_footprint(tm) > vmem_budget and d_ff % 128 == 0:
        # Resident weights don't fit (v7x at large d_ff): stream d_ff tiles.
        for cand in (4096, 2048, 1024, 512, 256, 128):
            if d_ff % cand == 0:
                weights = 2 * 2 * d_model * cand * wbytes   # double-buffered tiles
                io = 2 * tm * d_model * 2 * xbytes
                inter = tm * cand * (4 + wbytes) + tm * d_model * 4
                if weights + io + inter + (2 << 20) <= vmem_budget:
                    tf = cand
                    break
        use_tiled = tf is not None
        # TODO(synk): if no d_ff tile fits either, fall through to the resident
        # path and rely on the compiler (may exceed the VMEM limit).

    if use_tiled:
        out2 = _run_dff_tiled(x2, w1t, b1r, w2t, b2r, tm=tm, tf=tf,
                              grid_rows=grid_rows, vmem_limit=vmem_budget)
    else:
        out2 = _run_resident(x2, w1t, b1r, w2t, b2r, tm=tm,
                             grid_rows=grid_rows, vmem_limit=vmem_budget)
    return out2.reshape(orig_shape)


# --------------------------------------------------------------------------
# Self-test
# --------------------------------------------------------------------------
if __name__ == "__main__":
    d_model, d_ff = 64, 256
    batch, seq = 2, 8

    key = jax.random.PRNGKey(0)
    k_x, k_w1, k_b1, k_w2, k_b2 = jax.random.split(key, 5)

    x = jax.random.normal(k_x, (batch, seq, d_model), dtype=jnp.float32)
    # PyTorch nn.Linear layout: weight (out_features, in_features), bias (out,)
    w1 = jax.random.normal(k_w1, (d_ff, d_model), dtype=jnp.float32) * 0.1
    b1 = jax.random.normal(k_b1, (d_ff,), dtype=jnp.float32) * 0.1
    w2 = jax.random.normal(k_w2, (d_model, d_ff), dtype=jnp.float32) * 0.1
    b2 = jax.random.normal(k_b2, (d_model,), dtype=jnp.float32) * 0.1

    def reference(xx, w1t, b1r, w2t, b2r):
        # Emulates the kernel's precision: matmul operands in the weight dtype,
        # f32 accumulation, f32 bias-add/ReLU, eval-mode (identity) dropout.
        wd = w1t.dtype
        hp = jax.lax.Precision.HIGHEST
        h = jnp.maximum(
            jnp.dot(xx.astype(wd).astype(jnp.float32), w1t.astype(jnp.float32),
                    precision=hp) + b1r, 0.0)
        return jnp.dot(h.astype(wd).astype(jnp.float32), w2t.astype(jnp.float32),
                       precision=hp) + b2r

    # 1) Default path: bf16 weights, fully VMEM-resident.
    params_bf16 = prepare_ffn_params(w1, b1, w2, b2)
    out_bf16 = jax.block_until_ready(positionwise_feed_forward(x, params_bf16))
    ref_bf16 = reference(x.reshape(-1, d_model), *params_bf16).reshape(x.shape)
    assert out_bf16.shape == x.shape, out_bf16.shape
    assert out_bf16.dtype == x.dtype, out_bf16.dtype
    assert jnp.allclose(out_bf16, ref_bf16, atol=2e-3, rtol=2e-3), (
        float(jnp.max(jnp.abs(out_bf16 - ref_bf16))))

    # 2) Forced d_ff-tiled path (v7x streaming fallback; 2 reduction steps here).
    out_tiled = jax.block_until_ready(
        positionwise_feed_forward(x, params_bf16, d_ff_tile=128))
    assert jnp.allclose(out_tiled, ref_bf16, atol=2e-3, rtol=2e-3), (
        float(jnp.max(jnp.abs(out_tiled - ref_bf16))))

    # 3) f32-weight sanity check against the plain float32 reference.
    params_f32 = prepare_ffn_params(w1, b1, w2, b2, weight_dtype=jnp.float32)
    out_f32 = jax.block_until_ready(positionwise_feed_forward(x, params_f32))
    ref_f32 = jnp.maximum(x @ w1.T + b1, 0.0) @ w2.T + b2
    assert jnp.allclose(out_f32, ref_f32, atol=1e-4, rtol=1e-4), (
        float(jnp.max(jnp.abs(out_f32 - ref_f32))))

    print("KERNEL_OK")
</pallas_src>

<mosaic_0001>
module attributes {stable_mosaic.version = 11 : i64} {
  func.func @_ffn_resident_kernel(%arg0: i32, %arg1: memref<8x64xf32, #tpu.memory_space<vmem>>, %arg2: memref<64x256xbf16, #tpu.memory_space<vmem>>, %arg3: memref<1x256xf32, #tpu.memory_space<vmem>>, %arg4: memref<256x64xbf16, #tpu.memory_space<vmem>>, %arg5: memref<1x64xf32, #tpu.memory_space<vmem>>, %arg6: memref<8x64xf32, #tpu.memory_space<vmem>>) attributes {dimension_semantics = [#tpu.dimension_semantics<parallel>], iteration_bounds = array<i64: 2>, scalar_prefetch = 0 : i64, scratch_operands = 0 : i64, tpu.core_type = #tpu.core_type<tc>, window_params = [{transform_indices = @transform_0, window_bounds = array<i64: 8, 64>}, {pipeline_mode = #tpu.pipeline_mode<synchronous>, transform_indices = @transform_1, window_bounds = array<i64: 64, 256>}, {pipeline_mode = #tpu.pipeline_mode<synchronous>, transform_indices = @transform_2, window_bounds = array<i64: 1, 256>}, {pipeline_mode = #tpu.pipeline_mode<synchronous>, transform_indices = @transform_3, window_bounds = array<i64: 256, 64>}, {pipeline_mode = #tpu.pipeline_mode<synchronous>, transform_indices = @transform_4, window_bounds = array<i64: 1, 64>}, {transform_indices = @transform_5, window_bounds = array<i64: 8, 64>}]} {
    %c0 = arith.constant 0 : index
    %c0_0 = arith.constant 0 : index
    %0 = vector.load %arg1[%c0, %c0_0] : memref<8x64xf32, #tpu.memory_space<vmem>>, vector<8x64xf32>
    %1 = arith.truncf %0 : vector<8x64xf32> to vector<8x64xbf16>
    %c0_1 = arith.constant 0 : index
    %c0_2 = arith.constant 0 : index
    %2 = vector.load %arg2[%c0_1, %c0_2] : memref<64x256xbf16, #tpu.memory_space<vmem>>, vector<64x256xbf16>
    %cst = arith.constant dense<0.000000e+00> : vector<8x256xf32>
    %3 = tpu.matmul %1, %2, %cst {dimension_numbers = #tpu.dot_dimension_numbers<[1], [0], [0], [1], [0, 0, 1, 1], [], []>} : vector<8x64xbf16>, vector<64x256xbf16>, vector<8x256xf32> -> vector<8x256xf32>
    %c0_3 = arith.constant 0 : index
    %c0_4 = arith.constant 0 : index
    %4 = vector.load %arg3[%c0_3, %c0_4] : memref<1x256xf32, #tpu.memory_space<vmem>>, vector<1x256xf32>
    %5 = vector.broadcast %4 : vector<1x256xf32> to vector<8x256xf32>
    %6 = arith.addf %3, %5 : vector<8x256xf32>
    %cst_5 = arith.constant 0.000000e+00 : f32
    %7 = vector.broadcast %cst_5 : f32 to vector<8x256xf32>
    %8 = arith.maximumf %6, %7 : vector<8x256xf32>
    %9 = arith.truncf %8 : vector<8x256xf32> to vector<8x256xbf16>
    %c0_6 = arith.constant 0 : index
    %c0_7 = arith.constant 0 : index
    %10 = vector.load %arg4[%c0_6, %c0_7] : memref<256x64xbf16, #tpu.memory_space<vmem>>, vector<256x64xbf16>
    %cst_8 = arith.constant dense<0.000000e+00> : vector<8x64xf32>
    %11 = tpu.matmul %9, %10, %cst_8 {dimension_numbers = #tpu.dot_dimension_numbers<[1], [0], [0], [1], [0, 0, 1, 1], [], []>} : vector<8x256xbf16>, vector<256x64xbf16>, vector<8x64xf32> -> vector<8x64xf32>
    %c0_9 = arith.constant 0 : index
    %c0_10 = arith.constant 0 : index
    %12 = vector.load %arg5[%c0_9, %c0_10] : memref<1x64xf32, #tpu.memory_space<vmem>>, vector<1x64xf32>
    %13 = vector.broadcast %12 : vector<1x64xf32> to vector<8x64xf32>
    %14 = arith.addf %11, %13 : vector<8x64xf32>
    %c0_11 = arith.constant 0 : index
    %c0_12 = arith.constant 0 : index
    %15 = vector.load %arg6[%c0_11, %c0_12] : memref<8x64xf32, #tpu.memory_space<vmem>>, vector<8x64xf32>
    tpu.vector_store %arg6[%c0_11, %c0_12], %14 {strides = array<i32>} : memref<8x64xf32, #tpu.memory_space<vmem>>, vector<8x64xf32>,
    return
  }
  func.func @transform_0(%arg0: i32) -> (i32, i32) {
    %c0_i32 = arith.constant 0 : i32
    %c0_i32_0 = arith.constant 0 : i32
    return %arg0, %c0_i32 : i32, i32
  }
  func.func @transform_1(%arg0: i32) -> (i32, i32) {
    %c0_i32 = arith.constant 0 : i32
    %c0_i32_0 = arith.constant 0 : i32
    %c0_i32_1 = arith.constant 0 : i32
    return %c0_i32, %c0_i32_0 : i32, i32
  }
  func.func @transform_2(%arg0: i32) -> (i32, i32) {
    %c0_i32 = arith.constant 0 : i32
    %c0_i32_0 = arith.constant 0 : i32
    %c0_i32_1 = arith.constant 0 : i32
    return %c0_i32, %c0_i32_0 : i32, i32
  }
  func.func @transform_3(%arg0: i32) -> (i32, i32) {
    %c0_i32 = arith.constant 0 : i32
    %c0_i32_0 = arith.constant 0 : i32
    %c0_i32_1 = arith.constant 0 : i32
    return %c0_i32, %c0_i32_0 : i32, i32
  }
  func.func @transform_4(%arg0: i32) -> (i32, i32) {
    %c0_i32 = arith.constant 0 : i32
    %c0_i32_0 = arith.constant 0 : i32
    %c0_i32_1 = arith.constant 0 : i32
    return %c0_i32, %c0_i32_0 : i32, i32
  }
  func.func @transform_5(%arg0: i32) -> (i32, i32) {
    %c0_i32 = arith.constant 0 : i32
    %c0_i32_0 = arith.constant 0 : i32
    return %arg0, %c0_i32 : i32, i32
  }
}

module attributes {stable_mosaic.version = 11 : i64} {
  func.func @_ffn_resident_kernel(%arg0: i32, %arg1: memref<8x64xf32, #tpu.memory_space<vmem>>, %arg2: memref<64x256xbf16, #tpu.memory_space<vmem>>, %arg3: memref<1x256xf32, #tpu.memory_space<vmem>>, %arg4: memref<256x64xbf16, #tpu.memory_space<vmem>>, %arg5: memref<1x64xf32, #tpu.memory_space<vmem>>, %arg6: memref<8x64xf32, #tpu.memory_space<vmem>>) attributes {dimension_semantics = [#tpu.dimension_semantics<parallel>], iteration_bounds = array<i64: 2>, scalar_prefetch = 0 : i64, scratch_operands = 0 : i64, tpu.core_type = #tpu.core_type<tc>, window_params = [{transform_indices = @transform_0, window_bounds = array<i64: 8, 64>}, {pipeline_mode = #tpu.pipeline_mode<synchronous>, transform_indices = @transform_1, window_bounds = array<i64: 64, 256>}, {pipeline_mode = #tpu.pipeline_mode<synchronous>, transform_indices = @transform_2, window_bounds = array<i64: 1, 256>}, {pipeline_mode = #tpu.pipeline_mode<synchronous>, transform_indices = @transform_3, window_bounds = array<i64: 256, 64>}, {pipeline_mode = #tpu.pipeline_mode<synchronous>, transform_indices = @transform_4, window_bounds = array<i64: 1, 64>}, {transform_indices = @transform_5, window_bounds = array<i64: 8, 64>}]} {
    %c0 = arith.constant 0 : index
    %c0_0 = arith.constant 0 : index
    %0 = vector.load %arg1[%c0, %c0_0] : memref<8x64xf32, #tpu.memory_space<vmem>>, vector<8x64xf32>
    %1 = arith.truncf %0 : vector<8x64xf32> to vector<8x64xbf16>
    %c0_1 = arith.constant 0 : index
    %c0_2 = arith.constant 0 : index
    %2 = vector.load %arg2[%c0_1, %c0_2] : memref<64x256xbf16, #tpu.memory_space<vmem>>, vector<64x256xbf16>
    %cst = arith.constant dense<0.000000e+00> : vector<8x256xf32>
    %3 = tpu.matmul %1, %2, %cst {dimension_numbers = #tpu.dot_dimension_numbers<[1], [0], [0], [1], [0, 0, 1, 1], [], []>} : vector<8x64xbf16>, vector<64x256xbf16>, vector<8x256xf32> -> vector<8x256xf32>
    %c0_3 = arith.constant 0 : index
    %c0_4 = arith.constant 0 : index
    %4 = vector.load %arg3[%c0_3, %c0_4] : memref<1x256xf32, #tpu.memory_space<vmem>>, vector<1x256xf32>
    %5 = vector.broadcast %4 : vector<1x256xf32> to vector<8x256xf32>
    %6 = arith.addf %3, %5 : vector<8x256xf32>
    %cst_5 = arith.constant 0.000000e+00 : f32
    %7 = vector.broadcast %cst_5 : f32 to vector<8x256xf32>
    %8 = arith.maximumf %6, %7 : vector<8x256xf32>
    %9 = arith.truncf %8 : vector<8x256xf32> to vector<8x256xbf16>
    %c0_6 = arith.constant 0 : index
    %c0_7 = arith.constant 0 : index
    %10 = vector.load %arg4[%c0_6, %c0_7] : memref<256x64xbf16, #tpu.memory_space<vmem>>, vector<256x64xbf16>
    %cst_8 = arith.constant dense<0.000000e+00> : vector<8x64xf32>
    %11 = tpu.matmul %9, %10, %cst_8 {dimension_numbers = #tpu.dot_dimension_numbers<[1], [0], [0], [1], [0, 0, 1, 1], [], []>} : vector<8x256xbf16>, vector<256x64xbf16>, vector<8x64xf32> -> vector<8x64xf32>
    %c0_9 = arith.constant 0 : index
    %c0_10 = arith.constant 0 : index
    %12 = vector.load %arg5[%c0_9, %c0_10] : memref<1x64xf32, #tpu.memory_space<vmem>>, vector<1x64xf32>
    %13 = vector.broadcast %12 : vector<1x64xf32> to vector<8x64xf32>
    %14 = arith.addf %11, %13 : vector<8x64xf32>
    %c0_11 = arith.constant 0 : index
    %c0_12 = arith.constant 0 : index
    %15 = vector.load %arg6[%c0_11, %c0_12] : memref<8x64xf32, #tpu.memory_space<vmem>>, vector<8x64xf32>
    tpu.vector_store %arg6[%c0_11, %c0_12], %14 {strides = array<i32>} : memref<8x64xf32, #tpu.memory_space<vmem>>, vector<8x64xf32>,
    return
  }
  func.func @transform_0(%arg0: i32) -> (i32, i32) {
    %c0_i32 = arith.constant 0 : i32
    %c0_i32_0 = arith.constant 0 : i32
    return %arg0, %c0_i32 : i32, i32
  }
  func.func @transform_1(%arg0: i32) -> (i32, i32) {
    %c0_i32 = arith.constant 0 : i32
    %c0_i32_0 = arith.constant 0 : i32
    %c0_i32_1 = arith.constant 0 : i32
    return %c0_i32, %c0_i32_0 : i32, i32
  }
  func.func @transform_2(%arg0: i32) -> (i32, i32) {
    %c0_i32 = arith.constant 0 : i32
    %c0_i32_0 = arith.constant 0 : i32
    %c0_i32_1 = arith.constant 0 : i32
    return %c0_i32, %c0_i32_0 : i32, i32
  }
  func.func @transform_3(%arg0: i32) -> (i32, i32) {
    %c0_i32 = arith.constant 0 : i32
    %c0_i32_0 = arith.constant 0 : i32
    %c0_i32_1 = arith.constant 0 : i32
    return %c0_i32, %c0_i32_0 : i32, i32
  }
  func.func @transform_4(%arg0: i32) -> (i32, i32) {
    %c0_i32 = arith.constant 0 : i32
    %c0_i32_0 = arith.constant 0 : i32
    %c0_i32_1 = arith.constant 0 : i32
    return %c0_i32, %c0_i32_0 : i32, i32
  }
  func.func @transform_5(%arg0: i32) -> (i32, i32) {
    %c0_i32 = arith.constant 0 : i32
    %c0_i32_0 = arith.constant 0 : i32
    return %arg0, %c0_i32 : i32, i32
  }
}

</mosaic_0001>

<bundles_post_ra>
// kernel: tpu_custom_call.1
= control target key start
LH: loop header
LB: loop body
LE: loop exit
PB: predicated region body
PF: predicated region fallthrough
CT: control target
= control target key end

     0   :  { %10 = vsyncpa [#allocation3], 0  ;;  %s983_s0 = inlined_call_operand.vmem [shape: f32[16,64], index: 0, kind: input, shape index: {}]   ;;  %s984_s1 = inlined_call_operand.vmem [shape: bf16[64,256], index: 1, kind: input, shape index: {}]   ;;  %s985_s2 = inlined_call_operand.vmem [shape: f32[1,256], index: 2, kind: input, shape index: {}]   ;;  %s986_s3 = inlined_call_operand.vmem [shape: bf16[256,64], index: 3, kind: input, shape index: {}]   ;;  %s987_s4 = inlined_call_operand.vmem [shape: f32[1,64], index: 4, kind: input, shape index: {}]   ;;  %s988_s5 = inlined_call_operand.hbm [shape: f32[16,64], index: 5, kind: output, shape index: {}]  }
   0x1   :  { %12 = vsyncpa [#allocation3 + $0x1], 0  ;;  %s803_s18 = smov 0   ;;  %s805_s19 = smov 0  }
   0x2   :  { %s807_s20 = smov 0   ;;  %s809_s21 = smov 0  }
   0x3 LB: > { %s824_s22 = sadd.s32 4294967295, %s769_s21   ;;  %s581_s23 = sadd.s32 4294967294, %s769_s21   ;;  %s769_s21 = sphi %s809_s21, %s994_s21   ;;  %s765_s20 = sphi %s807_s20, %s993_s20   ;;  %s761_s19 = sphi %s805_s19, %s992_s19   ;;  %s757_s18 = sphi %s803_s18, %s991_s18  }
   0x4   : > { %s828_s24 = sadd.s32 1, %s769_s21   ;;  %s135_s25 = sadd.s32 1, %s765_s20 }
   0x5   : > { %s132_s26 = ssub.s32 %s769_s21, %s828_s24  ;;  %p145_p0 = scmp.ne.s32.totalorder %s765_s20, %s761_s19 }
   0x6   : > { %p133_p1 = scmp.eq.s32.totalorder %s132_s26, 0  ;;  %p146_p2 = scmp.eq.s32.totalorder %s824_s22, 1 }
   0x7   : > { %p151_p3 = scmp.ne.s32.totalorder %s761_s19, %s757_s18  ;;  %p152_p4 = scmp.eq.s32.totalorder %s581_s23, 1 }
   0x8   : > { %s839_s27 = scalar_select %p133_p1, %s765_s20, %s135_s25  }
   0x9   : > { %p841_p5 = por %p146_p2, %p145_p0  ;;  %p845_p6 = por %p152_p4, %p151_p3 }
   0xa   : > { %p584_p7 = scmp.ge.s32.totalorder %s769_s21, 1  ;;  %p189_p8 = scmp.lt.s32.totalorder %s769_s21, 3 }
   0xc   : > { %p190_p9 = pnand %p584_p7, %p189_p8 }
   0xd   : > { %v679_v0 = vld [vmem:[%s984_s1 + $0x4] ss:$8 sps:$4 sm:$0xff] (!%p190_p9)   ;;  %p216_p10 = scmp.lt.s32.totalorder (!%p190_p9), %s824_s22, 1  ;;  %v681_v1 = vld [vmem:[%s984_s1] ss:$8 sps:$4 sm:$0xff] (!%p190_p9)   ;;  %v771_v2 = vmov (!%p190_p9), 0   ;;  %v233_v27 = vlaneseq (!%p190_p9) }
   0xe   : > { %193 = sbr.rel (%p190_p9) target bundleno = 481 (0x1e1), region = 40  ;;  %319 = vmatprep.mubr.bf16.mxu0 (!%p190_p9), %v771_v2  ;;  %287 = vmatprep.subr.bf16.mxu0 (!%p190_p9), %v679_v0  ;;  %v682_v3 = vld [vmem:[%s984_s1 + $0x14] ss:$8 sps:$4 sm:$0xff] (!%p190_p9)   ;;  %v684_v4 = vld [vmem:[%s984_s1 + $0x10] ss:$8 sps:$4 sm:$0xff] (!%p190_p9)   ;;  %v691_v8 = vld [vmem:[%s986_s3 + $0x40] sm:$0xff] (!%p190_p9)  }
   0xf   : > { %288 = vmatpush1.bf16.msra.mxu0 (!%p190_p9), %v681_v1  ;;  %v685_v5 = vld [vmem:[%s984_s1 + $0x24] ss:$8 sps:$4 sm:$0xff] (!%p190_p9)   ;;  %v687_v6 = vld [vmem:[%s984_s1 + $0x20] ss:$8 sps:$4 sm:$0xff] (!%p190_p9)   ;;  %v688_v7 = vld [vmem:[%s984_s1 + $0x34] ss:$8 sps:$4 sm:$0xff] (!%p190_p9)   ;;  %617 = vmatprep.subr.bf16.mxu1 (!%p190_p9), %v691_v8 }
  0x10   : > { %289 = vmatprep.subr.bf16.mxu0 (!%p190_p9), %v682_v3  ;;  %v692_v9 = vld [vmem:[%s986_s3] sm:$0xff] (!%p190_p9)   ;;  %v693_v10 = vld [vmem:[%s986_s3 + $0x48] sm:$0xff] (!%p190_p9)   ;;  %v690_v11 = vld [vmem:[%s984_s1 + $0x30] ss:$8 sps:$4 sm:$0xff] (!%p190_p9)   ;;  %vm283_vm0 = vcmask (!%p190_p9), 523264   ;;  %v234_v28 = vshrl.u32 (!%p190_p9), %v233_v27, 7 }
  0x11   : > { %618 = vmatpush3.bf16.msra.mxu1 (!%p190_p9), %v692_v9  ;;  %v694_v12 = vld [vmem:[%s986_s3 + $0x8] sm:$0xff] (!%p190_p9)   ;;  %v695_v13 = vld [vmem:[%s986_s3 + $0x50] sm:$0xff] (!%p190_p9)   ;;  %v697_v17 = vld [vmem:[%s986_s3 + $0x58] sm:$0xff] (!%p190_p9)   ;;  %s614_s16 = sshll.u32 (!%p190_p9), %s824_s22, 7  ;;  %s772_s7 = smov (!%p190_p9), [#allocation2]  }
  0x12   : > { %619 = vmatprep.subr.bf16.mxu1 (!%p190_p9), %v693_v10  ;;  %v696_v15 = vld [vmem:[%s986_s3 + $0x10] sm:$0xff] (!%p190_p9)   ;;  %v698_v18 = vld [vmem:[%s986_s3 + $0x18] sm:$0xff] (!%p190_p9)   ;;  %v699_v19 = vld [vmem:[%s986_s3 + $0x60] sm:$0xff] (!%p190_p9)   ;;  %v235_v29 = vsub.s32 (!%p190_p9), 0, %v234_v28  ;;  %v239_v31 = vsub.s32 (!%p190_p9), 1, %v234_v28  ;;  %s940_s30 = scalar_lea.hbm (!%p190_p9), %s988_s5, %s614_s16  ;;  %s711_s8 = sshll.u32 (!%p190_p9), %s772_s7, 4  ;;  %s712_s8 = int_to_ptr.vmem [resolvable:$false] %s711_s8 }
  0x13   : > { %290 = vmatpush1.bf16.msra.mxu0 (!%p190_p9), %v684_v4  ;;  %v700_v20 = vld [vmem:[%s986_s3 + $0x20] sm:$0xff] (!%p190_p9)   ;;  %v701_v21 = vld [vmem:[%s986_s3 + $0x68] sm:$0xff] (!%p190_p9)   ;;  %v703_v23 = vld [vmem:[%s986_s3 + $0x70] sm:$0xff] (!%p190_p9)   ;;  %s713_s9 = scalar_lea.vmem (!%p190_p9), %s712_s8, 256 }
  0x14   : > { %291 = vmatprep.subr.bf16.mxu0 (!%p190_p9), %v685_v5  ;;  %v702_v22 = vld [vmem:[%s986_s3 + $0x28] sm:$0xff] (!%p190_p9)   ;;  %v704_v24 = vld [vmem:[%s986_s3 + $0x30] sm:$0xff] (!%p190_p9)   ;;  %v705_v25 = vld [vmem:[%s986_s3 + $0x78] sm:$0xff] (!%p190_p9)  }
  0x15   : > { %s217_s11 = scalar_select %p216_p10, %s824_s22, 1  ;;  %620 = vmatpush3.bf16.msra.mxu1 %v694_v12  ;;  %v706_v26 = vld [vmem:[%s986_s3 + $0x38] sm:$0xff]   ;;  %v231_v30 = vld [vmem:[%s985_s2] sm:$0x3] }
  0x16   : > { %621 = vmatprep.subr.bf16.mxu1 %v695_v13  ;;  %v236_v32 = vrot.slane %v231_v30, %v235_v29  ;;  %v240_v33 = vrot.slane %v231_v30, %v239_v31  ;;  %v596_v45 = vld [vmem:[%s987_s4] ss:$0 sm:$0xff] }
  0x17   : > { %s586_s23 = sshll.u32 %s217_s11, 3  ;;  %292 = vmatpush1.bf16.msra.mxu0 %v687_v6  ;;  %s213_s11 = sand.u32 1, %s761_s19  }
  0x18   : > { %s219_s12 = scalar_lea.vmem %s983_s0, %s586_s23  ;;  %293 = vmatprep.subr.bf16.mxu0 %v688_v7  ;;  %s585_s13 = sshll.u32 %s213_s11, 3 }
  0x19   : > { %v221_v14 = vld [vmem:[%s219_s12] sm:$0xff]  ;;  %622 = vmatpush3.bf16.msra.mxu1 %v696_v15  ;;  %s215_s17 = scalar_lea.vmem [#allocation2], %s585_s13  ;;  %s509_s6 = scalar_lea.sflag [#allocation3], %s213_s11 }
  0x1a   : > { %v222_v16 = vpack.c.bf16 %v221_v14, %v221_v14  ;;  %623 = vmatprep.subr.bf16.mxu1 %v697_v17  ;;  %s522_s25 = sshll.u32 %s215_s17, 4  ;;  %s942_s25 = int_to_ptr.vmem [resolvable:$true] %s522_s25 }
  0x1b   : > { %294 = vmatpush1.bf16.msra.mxu0 %v690_v11  ;;  %s707_s22 = scalar_lea.vmem %s942_s25, 128  ;;  %p714_p0 = scmp.lt.s32.totalorder %s942_s25, %s712_s8 }
  0x1c   : > { %p708_p11 = scmp.ne.s32.totalorder %s942_s25, %s707_s22  ;;  %p715_p1 = scmp.lt.s32.totalorder %s713_s9, %s707_s22 }
  0x1d   : > { %624 = vmatpush3.bf16.msra.mxu1 %v698_v18 }
  0x1e   : > { %595 = vmatmul.mubr.msk.bf16.vlgmr.msra.gmra.mrb[0].mxu0 %vm283_vm0, %v222_v16  ;;  %625 = vmatprep.subr.bf16.mxu1 %v699_v19  ;;  %p709_p12 = pnand %p708_p11, %p841_p5  ;;  %p716_p2 = por %p715_p1, %p714_p0 }
  0x20   : > { %p710_p13 = pneg %p709_p12 }
  0x21   : > { %626 = vmatpush3.bf16.msra.mxu1 %v700_v20 }
  0x22   : > { %627 = vmatprep.subr.bf16.mxu1 %v701_v21  ;;  %p717_p3 = pnand %p716_p2, %p710_p13 }
  0x25   : > { %628 = vmatpush3.bf16.msra.mxu1 %v702_v22 }
  0x26   : > { %629 = vmatprep.subr.bf16.mxu1 %v703_v23 }
  0x29   : > { %630 = vmatpush3.bf16.msra.mxu1 %v704_v24 }
  0x2a   : > { %631 = vmatprep.subr.bf16.mxu1 %v705_v25 }
  0x2d   : > { %632 = vmatpush3.bf16.msra.mxu1 %v706_v26 }
  0xf1   : > { %v321_v34 = vpop.f32.mrb[0].mxu0 }
  0xf2   : > { %v322_v35 = vadd.f32 %v321_v34, %v236_v32  ;;  %v323_v36 = vpop.f32.mrb[1].mxu0 }
  0xf3   : > { %v324_v37 = vadd.f32 %v323_v36, %v240_v33  ;;  %v325_v38 = vpop.f32.mrb[2].mxu0 }
  0xf4   : > { %v328_v39 = vmax.f32 %v322_v35, 0.0  ;;  %v326_v40 = vpop.f32.mrb[3].mxu0 }
  0xf5   : > { %v329_v41 = vmax.f32 %v324_v37, 0.0 }
  0xf6   : > { %v330_v43 = vpack.c.bf16 %v328_v39, %v328_v39 }
  0xf7   : > { %v331_v42 = vpack.c.bf16 %v329_v41, %v329_v41 }
  0xf9   : > { %499 = vmatprep.mubr.bf16.mxu1 %v331_v42 }
  0xfa   : > { %500 = vmatmul.mubr.bf16.vlgmr.msra.gmra.mrb[0].mxu1 %v330_v43 }
 0x1cd   : > { %v633_v44 = vpop.f32.mrb[0].mxu1 }
 0x1ce   : > { %v634_v46 = vpop.f32.mrb[1].mxu1 }
 0x1cf   : > { %v635_v47 = vadd.f32 %v634_v46, %v633_v44  ;;  %v636_v48 = vpop.f32.mrb[2].mxu1 }
 0x1d0   : > { %v637_v49 = vpop.f32.mrb[3].mxu1 }
 0x1d1   : > { %v502_v50 = vadd.f32 %v635_v47, %v596_v45 }
 0x1d3   : > { %507 = vst.msk [vmem:[%s215_s17] sm:$0xff] %vm283_vm0, %v502_v50 }
 0x1d4   : > { %720 = shalt.err (!%p717_p3)
}
 0x1d5   : > { %s721_s10 = scalar_lea.hbm %s940_s30, 128  ;;  %s725_s13 = scalar_lea.hbm %s988_s5, 256 }
 0x1d6   : > { %p722_p4 = scmp.ne.s32.totalorder %s940_s30, %s721_s10  ;;  %p726_p9 = scmp.lt.u32.totalorder %s940_s30, %s988_s5 }
 0x1d7   : > { %p727_p10 = scmp.lt.u32.totalorder %s725_s13, %s721_s10  ;;  %p729_p12 = scmp.lt.u32.totalorder %s721_s10, %s940_s30 }
 0x1d8   : > { %p723_p7 = pnand %p722_p4, %p841_p5 }
 0x1d9   : > { %p728_p11 = por %p727_p10, %p726_p9 }
 0x1da   : > { %p724_p8 = pneg %p723_p7 }
 0x1db   : > { %p730_p13 = por %p729_p12, %p728_p11 }
 0x1dd   : > { %p731_p0 = pnand %p730_p13, %p724_p8 }
 0x1df   : > { %734 = shalt.err (!%p731_p0)
}
 0x1e0   : > { %639 = dma.vmem_to_hbm [thread:$0]  (%p841_p5), %s942_s25, 128, %s940_s30, %s509_s6  }
 0x1e1 PF: > { %p645_p1 = scmp.ge.s32.totalorder %s769_s21, 2  ;;  %s534_s16 = sand.u32 1, %s757_s18  }
 0x1e2   : > { %s535_s17 = scalar_lea.sflag [#allocation3], %s534_s16 }
 0x1e3   : > { %p642_p2 = pnand %p645_p1, %p845_p6 }
 0x1e5   : > { %752 = dma.done.wait (!%p642_p2), %s535_s17, 128  }
 0x1e6   : > { %754 = vsyncadd (!%p642_p2), %s535_s17, 4294967168  ;;  %p15_p3 = scmp.ge.s32.totalorder %s828_s24, 4   ;;  %s991_s18 = smov %s761_s19 }
 0x1e7   : > { %s992_s19 = smov %s765_s20  ;;  %s993_s20 = smov %s839_s27 }
 0x1e8   : > { %s994_s21 = smov %s828_s24  ;;  %17 = sbr.rel (!%p15_p3) target bundleno = 3 (0x3), region = 75 }
 0x1ef   :  { %540 = vsyncpa [#allocation3], 1 }
 0x1f0   :  { %542 = vsyncpa [#allocation3 + $0x1], 1 }

// kernel: tpu_custom_call.1
= control target key start
LH: loop header
LB: loop body
LE: loop exit
PB: predicated region body
PF: predicated region fallthrough
CT: control target
= control target key end

     0   :  { %10 = vsyncpa [#allocation3], 0  ;;  %s983_s0 = inlined_call_operand.vmem [shape: f32[16,64], index: 0, kind: input, shape index: {}]   ;;  %s984_s1 = inlined_call_operand.vmem [shape: bf16[64,256], index: 1, kind: input, shape index: {}]   ;;  %s985_s2 = inlined_call_operand.vmem [shape: f32[1,256], index: 2, kind: input, shape index: {}]   ;;  %s986_s3 = inlined_call_operand.vmem [shape: bf16[256,64], index: 3, kind: input, shape index: {}]   ;;  %s987_s4 = inlined_call_operand.vmem [shape: f32[1,64], index: 4, kind: input, shape index: {}]   ;;  %s988_s5 = inlined_call_operand.hbm [shape: f32[16,64], index: 5, kind: output, shape index: {}]  }
   0x1   :  { %12 = vsyncpa [#allocation3 + $0x1], 0  ;;  %s803_s18 = smov 0   ;;  %s805_s19 = smov 0  }
   0x2   :  { %s807_s20 = smov 0   ;;  %s809_s21 = smov 0  }
   0x3 LB: > { %s824_s22 = sadd.s32 4294967295, %s769_s21   ;;  %s581_s23 = sadd.s32 4294967294, %s769_s21   ;;  %s769_s21 = sphi %s809_s21, %s994_s21   ;;  %s765_s20 = sphi %s807_s20, %s993_s20   ;;  %s761_s19 = sphi %s805_s19, %s992_s19   ;;  %s757_s18 = sphi %s803_s18, %s991_s18  }
   0x4   : > { %s828_s24 = sadd.s32 1, %s769_s21   ;;  %s135_s25 = sadd.s32 1, %s765_s20 }
   0x5   : > { %s132_s26 = ssub.s32 %s769_s21, %s828_s24  ;;  %p145_p0 = scmp.ne.s32.totalorder %s765_s20, %s761_s19 }
   0x6   : > { %p133_p1 = scmp.eq.s32.totalorder %s132_s26, 0  ;;  %p146_p2 = scmp.eq.s32.totalorder %s824_s22, 1 }
   0x7   : > { %p151_p3 = scmp.ne.s32.totalorder %s761_s19, %s757_s18  ;;  %p152_p4 = scmp.eq.s32.totalorder %s581_s23, 1 }
   0x8   : > { %s839_s27 = scalar_select %p133_p1, %s765_s20, %s135_s25  }
   0x9   : > { %p841_p5 = por %p146_p2, %p145_p0  ;;  %p845_p6 = por %p152_p4, %p151_p3 }
   0xa   : > { %p584_p7 = scmp.ge.s32.totalorder %s769_s21, 1  ;;  %p189_p8 = scmp.lt.s32.totalorder %s769_s21, 3 }
   0xc   : > { %p190_p9 = pnand %p584_p7, %p189_p8 }
   0xd   : > { %v679_v0 = vld [vmem:[%s984_s1 + $0x4] ss:$8 sps:$4 sm:$0xff] (!%p190_p9)   ;;  %p216_p10 = scmp.lt.s32.totalorder (!%p190_p9), %s824_s22, 1  ;;  %v681_v1 = vld [vmem:[%s984_s1] ss:$8 sps:$4 sm:$0xff] (!%p190_p9)   ;;  %v771_v2 = vmov (!%p190_p9), 0   ;;  %v233_v27 = vlaneseq (!%p190_p9) }
   0xe   : > { %193 = sbr.rel (%p190_p9) target bundleno = 481 (0x1e1), region = 40  ;;  %319 = vmatprep.mubr.bf16.mxu0 (!%p190_p9), %v771_v2  ;;  %287 = vmatprep.subr.bf16.mxu0 (!%p190_p9), %v679_v0  ;;  %v682_v3 = vld [vmem:[%s984_s1 + $0x14] ss:$8 sps:$4 sm:$0xff] (!%p190_p9)   ;;  %v684_v4 = vld [vmem:[%s984_s1 + $0x10] ss:$8 sps:$4 sm:$0xff] (!%p190_p9)   ;;  %v691_v8 = vld [vmem:[%s986_s3 + $0x40] sm:$0xff] (!%p190_p9)  }
   0xf   : > { %288 = vmatpush1.bf16.msra.mxu0 (!%p190_p9), %v681_v1  ;;  %v685_v5 = vld [vmem:[%s984_s1 + $0x24] ss:$8 sps:$4 sm:$0xff] (!%p190_p9)   ;;  %v687_v6 = vld [vmem:[%s984_s1 + $0x20] ss:$8 sps:$4 sm:$0xff] (!%p190_p9)   ;;  %v688_v7 = vld [vmem:[%s984_s1 + $0x34] ss:$8 sps:$4 sm:$0xff] (!%p190_p9)   ;;  %617 = vmatprep.subr.bf16.mxu1 (!%p190_p9), %v691_v8 }
  0x10   : > { %289 = vmatprep.subr.bf16.mxu0 (!%p190_p9), %v682_v3  ;;  %v692_v9 = vld [vmem:[%s986_s3] sm:$0xff] (!%p190_p9)   ;;  %v693_v10 = vld [vmem:[%s986_s3 + $0x48] sm:$0xff] (!%p190_p9)   ;;  %v690_v11 = vld [vmem:[%s984_s1 + $0x30] ss:$8 sps:$4 sm:$0xff] (!%p190_p9)   ;;  %vm283_vm0 = vcmask (!%p190_p9), 523264   ;;  %v234_v28 = vshrl.u32 (!%p190_p9), %v233_v27, 7 }
  0x11   : > { %618 = vmatpush3.bf16.msra.mxu1 (!%p190_p9), %v692_v9  ;;  %v694_v12 = vld [vmem:[%s986_s3 + $0x8] sm:$0xff] (!%p190_p9)   ;;  %v695_v13 = vld [vmem:[%s986_s3 + $0x50] sm:$0xff] (!%p190_p9)   ;;  %v697_v17 = vld [vmem:[%s986_s3 + $0x58] sm:$0xff] (!%p190_p9)   ;;  %s614_s16 = sshll.u32 (!%p190_p9), %s824_s22, 7  ;;  %s772_s7 = smov (!%p190_p9), [#allocation2]  }
  0x12   : > { %619 = vmatprep.subr.bf16.mxu1 (!%p190_p9), %v693_v10  ;;  %v696_v15 = vld [vmem:[%s986_s3 + $0x10] sm:$0xff] (!%p190_p9)   ;;  %v698_v18 = vld [vmem:[%s986_s3 + $0x18] sm:$0xff] (!%p190_p9)   ;;  %v699_v19 = vld [vmem:[%s986_s3 + $0x60] sm:$0xff] (!%p190_p9)   ;;  %v235_v29 = vsub.s32 (!%p190_p9), 0, %v234_v28  ;;  %v239_v31 = vsub.s32 (!%p190_p9), 1, %v234_v28  ;;  %s940_s30 = scalar_lea.hbm (!%p190_p9), %s988_s5, %s614_s16  ;;  %s711_s8 = sshll.u32 (!%p190_p9), %s772_s7, 4  ;;  %s712_s8 = int_to_ptr.vmem [resolvable:$false] %s711_s8 }
  0x13   : > { %290 = vmatpush1.bf16.msra.mxu0 (!%p190_p9), %v684_v4  ;;  %v700_v20 = vld [vmem:[%s986_s3 + $0x20] sm:$0xff] (!%p190_p9)   ;;  %v701_v21 = vld [vmem:[%s986_s3 + $0x68] sm:$0xff] (!%p190_p9)   ;;  %v703_v23 = vld [vmem:[%s986_s3 + $0x70] sm:$0xff] (!%p190_p9)   ;;  %s713_s9 = scalar_lea.vmem (!%p190_p9), %s712_s8, 256 }
  0x14   : > { %291 = vmatprep.subr.bf16.mxu0 (!%p190_p9), %v685_v5  ;;  %v702_v22 = vld [vmem:[%s986_s3 + $0x28] sm:$0xff] (!%p190_p9)   ;;  %v704_v24 = vld [vmem:[%s986_s3 + $0x30] sm:$0xff] (!%p190_p9)   ;;  %v705_v25 = vld [vmem:[%s986_s3 + $0x78] sm:$0xff] (!%p190_p9)  }
  0x15   : > { %s217_s11 = scalar_select %p216_p10, %s824_s22, 1  ;;  %620 = vmatpush3.bf16.msra.mxu1 %v694_v12  ;;  %v706_v26 = vld [vmem:[%s986_s3 + $0x38] sm:$0xff]   ;;  %v231_v30 = vld [vmem:[%s985_s2] sm:$0x3] }
  0x16   : > { %621 = vmatprep.subr.bf16.mxu1 %v695_v13  ;;  %v236_v32 = vrot.slane %v231_v30, %v235_v29  ;;  %v240_v33 = vrot.slane %v231_v30, %v239_v31  ;;  %v596_v45 = vld [vmem:[%s987_s4] ss:$0 sm:$0xff] }
  0x17   : > { %s586_s23 = sshll.u32 %s217_s11, 3  ;;  %292 = vmatpush1.bf16.msra.mxu0 %v687_v6  ;;  %s213_s11 = sand.u32 1, %s761_s19  }
  0x18   : > { %s219_s12 = scalar_lea.vmem %s983_s0, %s586_s23  ;;  %293 = vmatprep.subr.bf16.mxu0 %v688_v7  ;;  %s585_s13 = sshll.u32 %s213_s11, 3 }
  0x19   : > { %v221_v14 = vld [vmem:[%s219_s12] sm:$0xff]  ;;  %622 = vmatpush3.bf16.msra.mxu1 %v696_v15  ;;  %s215_s17 = scalar_lea.vmem [#allocation2], %s585_s13  ;;  %s509_s6 = scalar_lea.sflag [#allocation3], %s213_s11 }
  0x1a   : > { %v222_v16 = vpack.c.bf16 %v221_v14, %v221_v14  ;;  %623 = vmatprep.subr.bf16.mxu1 %v697_v17  ;;  %s522_s25 = sshll.u32 %s215_s17, 4  ;;  %s942_s25 = int_to_ptr.vmem [resolvable:$true] %s522_s25 }
  0x1b   : > { %294 = vmatpush1.bf16.msra.mxu0 %v690_v11  ;;  %s707_s22 = scalar_lea.vmem %s942_s25, 128  ;;  %p714_p0 = scmp.lt.s32.totalorder %s942_s25, %s712_s8 }
  0x1c   : > { %p708_p11 = scmp.ne.s32.totalorder %s942_s25, %s707_s22  ;;  %p715_p1 = scmp.lt.s32.totalorder %s713_s9, %s707_s22 }
  0x1d   : > { %624 = vmatpush3.bf16.msra.mxu1 %v698_v18 }
  0x1e   : > { %595 = vmatmul.mubr.msk.bf16.vlgmr.msra.gmra.mrb[0].mxu0 %vm283_vm0, %v222_v16  ;;  %625 = vmatprep.subr.bf16.mxu1 %v699_v19  ;;  %p709_p12 = pnand %p708_p11, %p841_p5  ;;  %p716_p2 = por %p715_p1, %p714_p0 }
  0x20   : > { %p710_p13 = pneg %p709_p12 }
  0x21   : > { %626 = vmatpush3.bf16.msra.mxu1 %v700_v20 }
  0x22   : > { %627 = vmatprep.subr.bf16.mxu1 %v701_v21  ;;  %p717_p3 = pnand %p716_p2, %p710_p13 }
  0x25   : > { %628 = vmatpush3.bf16.msra.mxu1 %v702_v22 }
  0x26   : > { %629 = vmatprep.subr.bf16.mxu1 %v703_v23 }
  0x29   : > { %630 = vmatpush3.bf16.msra.mxu1 %v704_v24 }
  0x2a   : > { %631 = vmatprep.subr.bf16.mxu1 %v705_v25 }
  0x2d   : > { %632 = vmatpush3.bf16.msra.mxu1 %v706_v26 }
  0xf1   : > { %v321_v34 = vpop.f32.mrb[0].mxu0 }
  0xf2   : > { %v322_v35 = vadd.f32 %v321_v34, %v236_v32  ;;  %v323_v36 = vpop.f32.mrb[1].mxu0 }
  0xf3   : > { %v324_v37 = vadd.f32 %v323_v36, %v240_v33  ;;  %v325_v38 = vpop.f32.mrb[2].mxu0 }
  0xf4   : > { %v328_v39 = vmax.f32 %v322_v35, 0.0  ;;  %v326_v40 = vpop.f32.mrb[3].mxu0 }
  0xf5   : > { %v329_v41 = vmax.f32 %v324_v37, 0.0 }
  0xf6   : > { %v330_v43 = vpack.c.bf16 %v328_v39, %v328_v39 }
  0xf7   : > { %v331_v42 = vpack.c.bf16 %v329_v41, %v329_v41 }
  0xf9   : > { %499 = vmatprep.mubr.bf16.mxu1 %v331_v42 }
  0xfa   : > { %500 = vmatmul.mubr.bf16.vlgmr.msra.gmra.mrb[0].mxu1 %v330_v43 }
 0x1cd   : > { %v633_v44 = vpop.f32.mrb[0].mxu1 }
 0x1ce   : > { %v634_v46 = vpop.f32.mrb[1].mxu1 }
 0x1cf   : > { %v635_v47 = vadd.f32 %v634_v46, %v633_v44  ;;  %v636_v48 = vpop.f32.mrb[2].mxu1 }
 0x1d0   : > { %v637_v49 = vpop.f32.mrb[3].mxu1 }
 0x1d1   : > { %v502_v50 = vadd.f32 %v635_v47, %v596_v45 }
 0x1d3   : > { %507 = vst.msk [vmem:[%s215_s17] sm:$0xff] %vm283_vm0, %v502_v50 }
 0x1d4   : > { %720 = shalt.err (!%p717_p3)
}
 0x1d5   : > { %s721_s10 = scalar_lea.hbm %s940_s30, 128  ;;  %s725_s13 = scalar_lea.hbm %s988_s5, 256 }
 0x1d6   : > { %p722_p4 = scmp.ne.s32.totalorder %s940_s30, %s721_s10  ;;  %p726_p9 = scmp.lt.u32.totalorder %s940_s30, %s988_s5 }
 0x1d7   : > { %p727_p10 = scmp.lt.u32.totalorder %s725_s13, %s721_s10  ;;  %p729_p12 = scmp.lt.u32.totalorder %s721_s10, %s940_s30 }
 0x1d8   : > { %p723_p7 = pnand %p722_p4, %p841_p5 }
 0x1d9   : > { %p728_p11 = por %p727_p10, %p726_p9 }
 0x1da   : > { %p724_p8 = pneg %p723_p7 }
 0x1db   : > { %p730_p13 = por %p729_p12, %p728_p11 }
 0x1dd   : > { %p731_p0 = pnand %p730_p13, %p724_p8 }
 0x1df   : > { %734 = shalt.err (!%p731_p0)
}
 0x1e0   : > { %639 = dma.vmem_to_hbm [thread:$0]  (%p841_p5), %s942_s25, 128, %s940_s30, %s509_s6  }
 0x1e1 PF: > { %p645_p1 = scmp.ge.s32.totalorder %s769_s21, 2  ;;  %s534_s16 = sand.u32 1, %s757_s18  }
 0x1e2   : > { %s535_s17 = scalar_lea.sflag [#allocation3], %s534_s16 }
 0x1e3   : > { %p642_p2 = pnand %p645_p1, %p845_p6 }
 0x1e5   : > { %752 = dma.done.wait (!%p642_p2), %s535_s17, 128  }
 0x1e6   : > { %754 = vsyncadd (!%p642_p2), %s535_s17, 4294967168  ;;  %p15_p3 = scmp.ge.s32.totalorder %s828_s24, 4   ;;  %s991_s18 = smov %s761_s19 }
 0x1e7   : > { %s992_s19 = smov %s765_s20  ;;  %s993_s20 = smov %s839_s27 }
 0x1e8   : > { %s994_s21 = smov %s828_s24  ;;  %17 = sbr.rel (!%p15_p3) target bundleno = 3 (0x3), region = 75 }
 0x1ef   :  { %540 = vsyncpa [#allocation3], 1 }
 0x1f0   :  { %542 = vsyncpa [#allocation3 + $0x1], 1 }

</bundles_post_ra>
